<compile_context>
chip_gen: v5e
topology: v5e:2x2
jax: 0.10.0
libtpu: 0.0.40
codegen_flags: <defaults>
</compile_context>

<pallas_src>
import jax
import jax.numpy as jnp
from jax.experimental import pallas as pl
from jax.experimental.pallas import tpu as pltpu

_MIB = 1024 * 1024


# ----------------------------------------------------------------------------
# Chip / VMEM helpers
# ----------------------------------------------------------------------------
def _tpu_generation() -> int:
    try:
        kind = jax.devices()[0].device_kind.lower()
    except Exception:
        return 0
    for g in (7, 6, 5, 4):
        if f"v{g}" in kind:
            return g
    return 0


def _vmem_capacity_bytes() -> int:
    gen = _tpu_generation()
    try:
        cap = int(pltpu.get_tpu_info().vmem_capacity_bytes)
    except Exception:
        cap = 128 * _MIB if (gen and gen < 7) else 64 * _MIB
    if gen >= 7:
        # v7x has 64 MiB VMEM *per TensorCore*; clamp in case the query
        # reports the per-chip figure.
        cap = min(cap, 64 * _MIB)
    return cap


def _vmem_limit_bytes() -> int:
    # Raise the scoped VMEM limit (defaults: 16 MiB v5e, 32 MiB v6e/v7x)
    # while leaving headroom below physical capacity.
    return int(_vmem_capacity_bytes() * 3 // 4)


def _sublane_multiple(itemsize: int) -> int:
    return {4: 8, 2: 16, 1: 32}.get(itemsize, 8)


def _pick_tile_rows(rows: int, row_bytes: int, n_big: int, itemsize: int,
                    resident_bytes: int = 0) -> int:
    """Sublane-aligned row tile for (rows, BD) elementwise streaming.

    n_big = number of (tile_rows, BD)-sized arrays live in VMEM (inputs + out),
    each double-buffered by the pipeline.  resident_bytes = small blocks whose
    index_map is constant (e.g. the folded sg row).
    """
    sub = _sublane_multiple(itemsize)
    if rows <= sub:
        return rows
    budget = _vmem_capacity_bytes() // 2 - resident_bytes
    budget = max(budget, n_big * 2 * sub * row_bytes)
    max_tile_bytes = budget // (2 * n_big)
    target_bytes = max(row_bytes, min(8 * _MIB, max_tile_bytes))
    tile = max(sub, (target_bytes // row_bytes) // sub * sub)
    if _tpu_generation() >= 7:
        # Keep >= ~4 grid steps so the megacore "parallel" axis has work for
        # both TensorCores.  Skipped on single-TC v5e/v6e.
        quarter = -(-rows // 4)
        quarter = -(-quarter // sub) * sub
        tile = min(tile, max(sub, quarter))
    return min(tile, rows)


def _scale_dtype(x_dtype):
    # bf16 VALU exists on v6e/v7x; keep f32 on v5e (and for f32 activations).
    if jnp.dtype(x_dtype) == jnp.dtype(jnp.bfloat16) and _tpu_generation() >= 6:
        return jnp.bfloat16
    return jnp.float32


def _keep_scale(keep_prob: float, B: int, key) -> jnp.ndarray:
    """Per-sample Bernoulli(keep_prob) mask / keep_prob, f32, shape (B,).

    Matches the PyTorch draw: floor(keep_prob + U[0,1)) per sample along the
    batch axis of the (L, B, D) tensor.
    """
    u = jax.random.uniform(key, (B,), dtype=jnp.float32)
    mask = jnp.floor(jnp.float32(keep_prob) + u)          # {0., 1.}
    return mask * jnp.float32(1.0 / keep_prob)


# ----------------------------------------------------------------------------
# Kernels  (x viewed as (L, B*D); sg is a resident (1, B*D) row)
# ----------------------------------------------------------------------------
def _scale_kernel(x_ref, sg_ref, o_ref):
    # out[l, :] = sg[:] * x[l, :]
    o_ref[...] = (sg_ref[...] * x_ref[...]).astype(o_ref.dtype)


def _residual_fma_kernel(x_ref, r_ref, sg_ref, o_ref):
    # out[l, :] = residual[l, :] + sg[:] * x[l, :]
    o_ref[...] = (r_ref[...] + sg_ref[...] * x_ref[...]).astype(o_ref.dtype)


# ----------------------------------------------------------------------------
# Public wrappers
# ----------------------------------------------------------------------------
def drop_path(x, drop_prob: float = 0.0, training: bool = False,
              *, key=None, tile_rows: int | None = None):
    """drop_path(x, drop_prob, training) on x of shape (L, B, D)."""
    if drop_prob == 0.0 or not training:
        return x
    if key is None:
        raise ValueError("drop_path: an explicit PRNG key is required when "
                         "training with drop_prob > 0.")

    keep_prob = 1.0 - drop_prob
    L, B, D = x.shape
    BD = B * D
    itemsize = jnp.dtype(x.dtype).itemsize
    sdt = _scale_dtype(x.dtype)

    # Fold mask/keep_prob into a per-column row of the (L, B*D) view.
    scale = _keep_scale(keep_prob, B, key)                 # (B,) f32
    sg = jnp.repeat(scale, D).reshape(1, BD).astype(sdt)   # (1, B*D)
    x2 = x.reshape(L, BD)

    if tile_rows is None:
        tile_rows = _pick_tile_rows(
            L, BD * itemsize, n_big=2, itemsize=itemsize,
            resident_bytes=2 * BD * jnp.dtype(sdt).itemsize)
    grid = (pl.cdiv(L, tile_rows),)

    out = pl.pallas_call(
        _scale_kernel,
        out_shape=jax.ShapeDtypeStruct((L, BD), x.dtype),
        grid_spec=pltpu.PrefetchScalarGridSpec(
            num_scalar_prefetch=0,
            grid=grid,
            in_specs=[
                pl.BlockSpec((tile_rows, BD), lambda i: (i, 0)),   # x
                pl.BlockSpec((1, BD), lambda i: (0, 0)),           # sg (resident)
            ],
            out_specs=pl.BlockSpec((tile_rows, BD), lambda i: (i, 0)),
        ),
        input_output_aliases={0: 0},
        compiler_params=pltpu.CompilerParams(
            dimension_semantics=("parallel",),
            vmem_limit_bytes=_vmem_limit_bytes()),
    )(x2, sg)
    return out.reshape(L, B, D)


def drop_path_residual(x, residual, gamma, drop_prob: float = 0.0,
                       training: bool = False, *, key=None,
                       tile_rows: int | None = None):
    """Fused TransformerEncoderLayer.residual_connection:
        out = residual + drop_path(gamma * x)
    x, residual: (L, B, D); gamma: (D,) or None.  Single pass over the
    activations; per-sample scale folded into gamma -> single FMA per vreg.
    """
    L, B, D = x.shape
    BD = B * D
    itemsize = jnp.dtype(x.dtype).itemsize
    sdt = _scale_dtype(x.dtype)

    g = jnp.ones((D,), dtype=jnp.float32) if gamma is None \
        else jnp.asarray(gamma, dtype=jnp.float32).reshape(D)

    active = (drop_prob > 0.0) and training
    if active:
        if key is None:
            raise ValueError("drop_path_residual: an explicit PRNG key is "
                             "required when training with drop_prob > 0.")
        scale = _keep_scale(1.0 - drop_prob, B, key)        # (B,) f32
        sg = (scale[:, None] * g[None, :]).reshape(1, BD)   # (1, B*D)
    else:
        sg = jnp.broadcast_to(g[None, :], (B, D)).reshape(1, BD)
    sg = sg.astype(sdt)

    x2 = x.reshape(L, BD)
    r2 = residual.reshape(L, BD)

    if tile_rows is None:
        tile_rows = _pick_tile_rows(
            L, BD * itemsize, n_big=3, itemsize=itemsize,
            resident_bytes=2 * BD * jnp.dtype(sdt).itemsize)
    grid = (pl.cdiv(L, tile_rows),)

    out = pl.pallas_call(
        _residual_fma_kernel,
        out_shape=jax.ShapeDtypeStruct((L, BD), x.dtype),
        grid_spec=pltpu.PrefetchScalarGridSpec(
            num_scalar_prefetch=0,
            grid=grid,
            in_specs=[
                pl.BlockSpec((tile_rows, BD), lambda i: (i, 0)),   # x
                pl.BlockSpec((tile_rows, BD), lambda i: (i, 0)),   # residual
                pl.BlockSpec((1, BD), lambda i: (0, 0)),           # sg (resident)
            ],
            out_specs=pl.BlockSpec((tile_rows, BD), lambda i: (i, 0)),
        ),
        input_output_aliases={1: 0},   # residual buffer -> output
        compiler_params=pltpu.CompilerParams(
            dimension_semantics=("parallel",),
            vmem_limit_bytes=_vmem_limit_bytes()),
    )(x2, r2, sg)
    return out.reshape(L, B, D)


class DropPath:
    """Mirror of the PyTorch nn.Module (training flag / key passed explicitly)."""

    def __init__(self, drop_prob=None):
        self.drop_prob = drop_prob if drop_prob is not None else 0.0
        self.training = True

    def __call__(self, x, *, key=None):
        return drop_path(x, self.drop_prob, self.training, key=key)


# TODO(synk): the rest of OnePeaceViT (conv patch-embed stem, attention, GeGLU,
# LayerNorms, classifier head) is left to XLA.  The review's biggest lever —
# fusing this residual epilogue into the producing out-proj / fc2 matmul's
# k==last finalize (P3) — requires kernelizing those matmuls and is not done here.

if __name__ == "__main__":
    root = jax.random.PRNGKey(0)
    kx, kr, kg, kmask = jax.random.split(root, 4)

    # Small (L, B, D) shapes consistent with the encoder layout; D lane-aligned.
    L, B, D = 16, 4, 128
    x = jax.random.normal(kx, (L, B, D), dtype=jnp.float32)
    residual = jax.random.normal(kr, (L, B, D), dtype=jnp.float32)
    gamma = 0.01 * (1.0 + 0.1 * jax.random.normal(kg, (D,), dtype=jnp.float32))

    drop_prob = 0.25
    keep_prob = 1.0 - drop_prob

    # Reference mask: identical construction to the wrapper's draw.
    u = jax.random.uniform(kmask, (B,), dtype=jnp.float32)
    mask = jnp.floor(jnp.float32(keep_prob) + u)                      # (B,)
    scale_b = (mask * jnp.float32(1.0 / keep_prob))[None, :, None]    # (1,B,1)

    # 1) standalone DropPath (training mode)
    module = DropPath(drop_prob)
    module.training = True
    out = jax.block_until_ready(module(x, key=kmask))
    ref = x * scale_b
    assert out.shape == x.shape and out.dtype == x.dtype
    assert jnp.allclose(out, ref, atol=1e-6, rtol=1e-6)

    # 2) eval mode / drop_prob=0 path is the identity (no kernel launched).
    module.training = False
    assert jnp.array_equal(module(x, key=kmask), x)

    # 3) fused residual_connection:  residual + drop_path(gamma * x)
    fused = jax.block_until_ready(
        drop_path_residual(x, residual, gamma, drop_prob, True, key=kmask))
    ref_fused = residual + scale_b * (gamma[None, None, :] * x)
    assert jnp.allclose(fused, ref_fused, atol=1e-5, rtol=1e-5)

    # 4) fused eval path:  residual + gamma * x   (no mask array materialized)
    fused_eval = jax.block_until_ready(
        drop_path_residual(x, residual, gamma, drop_prob, False))
    ref_eval = residual + gamma[None, None, :] * x
    assert jnp.allclose(fused_eval, ref_eval, atol=1e-5, rtol=1e-5)

    # 5) fused eval path without gamma:  residual + x
    fused_ng = jax.block_until_ready(
        drop_path_residual(x, residual, None, drop_prob, False))
    assert jnp.allclose(fused_ng, residual + x, atol=1e-5, rtol=1e-5)

    # 6) bf16 activations (sg kept bf16 on v6e/v7x, f32 on v5e)
    xb = x.astype(jnp.bfloat16)
    rb = residual.astype(jnp.bfloat16)
    fused_bf16 = jax.block_until_ready(
        drop_path_residual(xb, rb, gamma, drop_prob, True, key=kmask))
    ref_bf16 = (rb.astype(jnp.float32)
                + scale_b * (gamma[None, None, :] * xb.astype(jnp.float32)))
    assert fused_bf16.dtype == jnp.bfloat16
    assert jnp.allclose(fused_bf16.astype(jnp.float32), ref_bf16,
                        atol=5e-2, rtol=5e-2)

    print("KERNEL_OK")
</pallas_src>

<mosaic_0001>
module attributes {stable_mosaic.version = 11 : i64} {
  func.func @_scale_kernel(%arg0: i32, %arg1: memref<16x512xf32, #tpu.memory_space<vmem>>, %arg2: memref<1x512xf32, #tpu.memory_space<vmem>>, %arg3: memref<16x512xf32, #tpu.memory_space<vmem>>) attributes {dimension_semantics = [#tpu.dimension_semantics<parallel>], iteration_bounds = array<i64: 1>, scalar_prefetch = 0 : i64, scratch_operands = 0 : i64, tpu.core_type = #tpu.core_type<tc>, window_params = [{transform_indices = @transform_0, window_bounds = array<i64: 16, 512>}, {pipeline_mode = #tpu.pipeline_mode<synchronous>, transform_indices = @transform_1, window_bounds = array<i64: 1, 512>}, {transform_indices = @transform_2, window_bounds = array<i64: 16, 512>}]} {
    %c0 = arith.constant 0 : index
    %c0_0 = arith.constant 0 : index
    %0 = vector.load %arg2[%c0, %c0_0] : memref<1x512xf32, #tpu.memory_space<vmem>>, vector<1x512xf32>
    %c0_1 = arith.constant 0 : index
    %c0_2 = arith.constant 0 : index
    %1 = vector.load %arg1[%c0_1, %c0_2] : memref<16x512xf32, #tpu.memory_space<vmem>>, vector<16x512xf32>
    %2 = vector.broadcast %0 : vector<1x512xf32> to vector<16x512xf32>
    %3 = arith.mulf %2, %1 : vector<16x512xf32>
    %c0_3 = arith.constant 0 : index
    %c0_4 = arith.constant 0 : index
    %4 = vector.load %arg3[%c0_3, %c0_4] : memref<16x512xf32, #tpu.memory_space<vmem>>, vector<16x512xf32>
    tpu.vector_store %arg3[%c0_3, %c0_4], %3 {strides = array<i32>} : memref<16x512xf32, #tpu.memory_space<vmem>>, vector<16x512xf32>,
    return
  }
  func.func @transform_0(%arg0: i32) -> (i32, i32) {
    %c0_i32 = arith.constant 0 : i32
    %c0_i32_0 = arith.constant 0 : i32
    return %arg0, %c0_i32 : i32, i32
  }
  func.func @transform_1(%arg0: i32) -> (i32, i32) {
    %c0_i32 = arith.constant 0 : i32
    %c0_i32_0 = arith.constant 0 : i32
    %c0_i32_1 = arith.constant 0 : i32
    return %c0_i32, %c0_i32_0 : i32, i32
  }
  func.func @transform_2(%arg0: i32) -> (i32, i32) {
    %c0_i32 = arith.constant 0 : i32
    %c0_i32_0 = arith.constant 0 : i32
    return %arg0, %c0_i32 : i32, i32
  }
}

</mosaic_0001>

<bundles_post_ra>
// kernel: tpu_custom_call.1
= control target key start
LH: loop header
LB: loop body
LE: loop exit
PB: predicated region body
PF: predicated region fallthrough
CT: control target
= control target key end

     0   :  { %7 = vsyncpa [#allocation3], 0  ;;  %s171_s0 = inlined_call_operand.hbm [shape: f32[16,512], index: 0, kind: input, shape index: {}, may-alias: {0,2}]   ;;  %s172_s1 = inlined_call_operand.vmem [shape: f32[1,512], index: 1, kind: input, shape index: {}]   ;;  %s173_s2 = inlined_call_operand.hbm [shape: f32[16,512], index: 2, kind: output, shape index: {}, may-alias: {0,2}]  }
   0x1   :  { %8 = vsyncpa [#allocation4], 0  ;;  %s13_s11 = sshll.u32 %s171_s0, 4  ;;  %s137_s12 = smov [#allocation2]   ;;  %s14_s11 = int_to_ptr.hbm [resolvable:$true] %s13_s11 }
   0x2   :  { %s15_s13 = sshll.u32 %s137_s12, 4  ;;  %s138_s14 = smov 512   ;;  %s16_s13 = int_to_ptr.vmem [resolvable:$true] %s15_s13 }
   0x3   :  { %s139_s15 = smov 32  }
   0x4   :  { %21 = dma.hbm_to_vmem [thread:$0]  %s14_s11, 1024, %s16_s13, [#allocation3], %s138_s14, %s138_s14, %s139_s15  }
   0x5   :  { %133 = dma.done.wait [#allocation3], 1024  }
   0x6   :  { %134 = vsyncadd [#allocation3], 4294966272  ;;  %v28_v0 = vld [vmem:[%s172_s1] sm:$0xf]  ;;  %v30_v2 = vld [vmem:[#allocation2 + $0x8] sm:$0xff]  ;;  %s140_s0 = smov [#allocation5]  }
   0x7   :  { %v29_v1 = vld [vmem:[#allocation2] sm:$0xff]  ;;  %v38_v3 = vperm.slane %v28_v0, 0  ;;  %v39_v4 = vperm.slane %v28_v0, 1  ;;  %v31_v5 = vld [vmem:[#allocation2 + $0x10] sm:$0xff]  ;;  %v40_v6 = vperm.slane %v28_v0, 2  ;;  %v32_v7 = vld [vmem:[#allocation2 + $0x18] sm:$0xff] }
   0x8   :  { %v41_v8 = vperm.slane %v28_v0, 3  ;;  %v33_v9 = vld [vmem:[#allocation2 + $0x20] sm:$0xff]  ;;  %v34_v13 = vld [vmem:[#allocation2 + $0x28] sm:$0xff]  ;;  %v35_v15 = vld [vmem:[#allocation2 + $0x30] sm:$0xff]  ;;  %s66_s1 = sshll.u32 %s140_s0, 4  ;;  %s68_s20 = sshll.u32 %s173_s2, 4  ;;  %s67_s1 = int_to_ptr.vmem [resolvable:$true] %s66_s1  ;;  %s69_s20 = int_to_ptr.hbm [resolvable:$true] %s68_s20 }
   0x9   :  { %v46_v10 = vmul.f32 %v38_v3, %v29_v1  ;;  %v47_v11 = vmul.f32 %v39_v4, %v30_v2  ;;  %v48_v12 = vmul.f32 %v40_v6, %v31_v5  ;;  %v50_v16 = vmul.f32 %v38_v3, %v33_v9  ;;  %v36_v17 = vld [vmem:[#allocation2 + $0x38] sm:$0xff] }
   0xa   :  { %v49_v14 = vmul.f32 %v41_v8, %v32_v7  ;;  %v51_v18 = vmul.f32 %v39_v4, %v34_v13  ;;  %v52_v19 = vmul.f32 %v40_v6, %v35_v15  ;;  %v53_v20 = vmul.f32 %v41_v8, %v36_v17 }
   0xb   :  { %54 = vst [vmem:[#allocation5] sm:$0xff] %v46_v10 }
   0xc   :  { %55 = vst [vmem:[#allocation5 + $0x8] sm:$0xff] %v47_v11 }
   0xd   :  { %56 = vst [vmem:[#allocation5 + $0x10] sm:$0xff] %v48_v12 }
   0xe   :  { %57 = vst [vmem:[#allocation5 + $0x18] sm:$0xff] %v49_v14 }
   0xf   :  { %58 = vst [vmem:[#allocation5 + $0x20] sm:$0xff] %v50_v16 }
  0x10   :  { %59 = vst [vmem:[#allocation5 + $0x28] sm:$0xff] %v51_v18 }
  0x11   :  { %60 = vst [vmem:[#allocation5 + $0x30] sm:$0xff] %v52_v19 }
  0x12   :  { %61 = vst [vmem:[#allocation5 + $0x38] sm:$0xff] %v53_v20 }
  0x13   :  { %74 = dma.vmem_to_hbm [thread:$0]  %s67_s1, 1024, %s69_s20, [#allocation4], %s138_s14, %s138_s14, %s139_s15  }
  0x14   :  { %135 = dma.done.wait [#allocation4], 1024  }
  0x15   :  { %136 = vsyncadd [#allocation4], 4294966272 }
  0x16   :  { %79 = vsyncpa [#allocation3], 1 }
  0x17   :  { %80 = vsyncpa [#allocation4], 1 }

</bundles_post_ra>
